<compile_context>
chip_gen: v6e
topology: v6e:2x2x1
jax: 0.10.0
libtpu: 0.0.40
codegen_flags: <defaults>
</compile_context>

<pallas_src>
import math

import jax
import jax.numpy as jnp
from jax import lax
from jax.experimental import pallas as pl
from jax.experimental.pallas import tpu as pltpu

NEG_SLOPE = 0.2          # LeakyReLU negative slope (module default)
_NEG_INF = -1e30         # softmax mask fill
_TILE_M = 256            # dst-row tile; sized to fit v7x's 64 MiB VMEM when
                         # double-buffered (re-derive if N grows very large)


def _gat_row_tile_kernel(h_tile_ref, h_full_ref, adj_ref, wc_ref, br_ref, out_ref):
    """One tile of destination rows.

    h_tile_ref : [tm, in_dim]   f32  rows of h for this dst tile
    h_full_ref : [N,  in_dim]   f32  all rows of h (src side)
    adj_ref    : [tm, N]        bf16 adj[d, s] = 1 iff edge s -> d
    wc_ref     : [in_dim, 2*Dp] f32  [W_pad | Wr^T_pad]  (Dp = D padded to 128)
    br_ref     : [1, Dp]        f32  residual bias (zero-padded)
    out_ref    : [tm, Dp]       f32  ELU(aggregate + residual), lane-dense
    """
    dp = wc_ref.shape[1] // 2

    h_t = h_tile_ref[...]
    h_f = h_full_ref[...]
    wc = wc_ref[...]

    # Fused dst-side projection: [H_dst | res] = h_tile @ [W | Wr^T]
    hr = jnp.dot(h_t, wc, preferred_element_type=jnp.float32)        # [tm, 2Dp]
    h_dst = hr[:, :dp]                                                # [tm, Dp]
    res = hr[:, dp:] + br_ref[...]                                    # [tm, Dp]

    # Src-side projection for every node (attention/aggregation read all srcs).
    h_src = jnp.dot(h_f, wc[:, :dp], preferred_element_type=jnp.float32)  # [N, Dp]

    # bf16 operands for the two big MXU contractions; accumulation stays f32.
    h_dst_b = h_dst.astype(jnp.bfloat16)
    h_src_b = h_src.astype(jnp.bfloat16)

    # S[d, s] = <H[d], H[s]> -- contract the feature dim of both operands
    # directly (no explicit transpose of H).
    s = lax.dot_general(h_dst_b, h_src_b,
                        dimension_numbers=(((1,), (1,)), ((), ())),
                        preferred_element_type=jnp.float32)           # [tm, N]
    s = jnp.where(s >= 0.0, s, NEG_SLOPE * s)                         # LeakyReLU

    # Masked edge-softmax over incoming edges (rows), elementwise math in f32.
    adjf = adj_ref[...].astype(jnp.float32)                           # 0/1
    masked = jnp.where(adjf > 0.0, s, _NEG_INF)
    m = jnp.max(masked, axis=-1, keepdims=True)                       # [tm, 1]
    e = jnp.exp(masked - m) * adjf       # single gating pass; isolated rows -> 0
    denom = jnp.sum(e, axis=-1, keepdims=True)
    deg = jnp.maximum(jnp.sum(adjf, axis=-1, keepdims=True), 1.0)

    # Fold the mean-over-in-edges (1/deg) into the softmax normaliser; the
    # reciprocal runs on the (otherwise idle) EUP instead of two VPU divides.
    inv = pl.reciprocal(jnp.maximum(denom * deg, 1e-30), approx=True)  # [tm, 1]
    att = (e * inv).astype(jnp.bfloat16)                               # [tm, N]

    agg = lax.dot_general(att, h_src_b,
                          dimension_numbers=(((1,), (0,)), ((), ())),
                          preferred_element_type=jnp.float32)          # [tm, Dp]

    out = agg + res
    # ELU (alpha = 1); padding columns are exactly 0 and ELU(0) = 0.
    out_ref[...] = jnp.where(out > 0.0, out, jnp.exp(out) - 1.0)


def my_layer_forward(h, W, adj, Wr, br, *, tile_m=_TILE_M):
    """h: [N, in_dim], W: [in_dim, D], adj: [N, N] (adj[d, s]),
    Wr: [D, in_dim] (torch Linear layout), br: [D].  Returns [N, D] f32."""
    N, in_dim = h.shape
    D = W.shape[1]

    # Pad the feature dim up to a multiple of 128 so every matmul operand and
    # the output store are lane-dense. Padding columns are exactly zero
    # end-to-end; the result is sliced back to [N, D] outside the kernel.
    Dp = ((D + 127) // 128) * 128
    pad = Dp - D
    Wp = jnp.pad(W, ((0, 0), (0, pad)))                    # [in_dim, Dp]
    Wrp = jnp.pad(Wr.T, ((0, 0), (0, pad)))                # [in_dim, Dp]
    brp = jnp.pad(br, (0, pad)).reshape(1, Dp)             # [1, Dp]
    Wc = jnp.concatenate([Wp, Wrp], axis=1)                # [in_dim, 2*Dp]

    # adj is only a 0/1 mask: ship it as bf16 (exact) to halve its (dominant)
    # N^2 HBM traffic. Ideally the caller stores it narrow to begin with.
    adj_b = adj.astype(jnp.bfloat16)

    tm = min(tile_m, N)
    grid_m = pl.cdiv(N, tm)

    out_padded = pl.pallas_call(
        _gat_row_tile_kernel,
        out_shape=jax.ShapeDtypeStruct((N, Dp), jnp.float32),
        grid=(grid_m,),
        in_specs=[
            pl.BlockSpec((tm, in_dim), lambda i: (i, 0)),   # h, dst-row tile
            pl.BlockSpec((N, in_dim), lambda i: (0, 0)),    # h, all rows (src)
            pl.BlockSpec((tm, N), lambda i: (i, 0)),        # adj rows of tile
            pl.BlockSpec((in_dim, 2 * Dp), lambda i: (0, 0)),
            pl.BlockSpec((1, Dp), lambda i: (0, 0)),
        ],
        out_specs=pl.BlockSpec((tm, Dp), lambda i: (i, 0)),
        compiler_params=pltpu.CompilerParams(
            # Row tiles are independent -> shard across both TCs on v7x.
            dimension_semantics=("parallel",),
            # Explicit scoped-VMEM budget; safe on v7x's 64 MiB physical VMEM.
            vmem_limit_bytes=32 * 1024 * 1024,
        ),
    )(h, h, adj_b, Wc, brp)

    return out_padded[:, :D]


if __name__ == "__main__":
    # Small shapes consistent with the module
    N = 16             # number of graph nodes
    in_dim = 32
    out_dim = 16
    num_heads = 4
    D = out_dim * num_heads   # 64

    key = jax.random.PRNGKey(0)
    k_h, k_w, k_wr, k_br, k_adj = jax.random.split(key, 5)

    h = jax.random.normal(k_h, (N, in_dim), dtype=jnp.float32)

    # xavier_uniform for W [in_dim, D]
    lim_w = math.sqrt(6.0 / (in_dim + D))
    W = jax.random.uniform(k_w, (in_dim, D), minval=-lim_w, maxval=lim_w,
                           dtype=jnp.float32)

    # nn.Linear(in_dim, D) default init (kaiming-uniform-ish); deterministic
    lim_r = 1.0 / math.sqrt(in_dim)
    Wr = jax.random.uniform(k_wr, (D, in_dim), minval=-lim_r, maxval=lim_r,
                            dtype=jnp.float32)
    br = jax.random.uniform(k_br, (D,), minval=-lim_r, maxval=lim_r,
                            dtype=jnp.float32)

    # Random sparse-ish adjacency with self-loops (adj[d, s] = 1 for edge s->d),
    # stored as bf16 (0/1 are exact).
    adj = (jax.random.uniform(k_adj, (N, N)) < 0.3).astype(jnp.float32)
    adj = jnp.maximum(adj, jnp.eye(N, dtype=jnp.float32)).astype(jnp.bfloat16)

    out = my_layer_forward(h, W, adj, Wr, br)
    jax.block_until_ready(out)

    # Pure-JAX reference. It mirrors the kernel's bf16 MXU operands so the
    # tolerance only has to absorb the approximate reciprocal / op ordering.
    adjf = (adj > 0).astype(jnp.float32)
    H = h @ W
    Hb = H.astype(jnp.bfloat16)
    S = jnp.dot(Hb, Hb.T, preferred_element_type=jnp.float32)
    S = jnp.where(S >= 0, S, NEG_SLOPE * S)
    masked = jnp.where(adjf > 0, S, _NEG_INF)
    e = jnp.exp(masked - masked.max(-1, keepdims=True)) * adjf
    denom = jnp.maximum(e.sum(-1, keepdims=True), 1e-30)
    deg = jnp.maximum(adjf.sum(-1, keepdims=True), 1.0)
    att = (e / (denom * deg)).astype(jnp.bfloat16)
    agg = jnp.dot(att, Hb, preferred_element_type=jnp.float32)
    ref = agg + h @ Wr.T + br
    ref = jnp.where(ref > 0, ref, jnp.exp(ref) - 1.0)

    assert out.shape == (N, D)
    err = float(jnp.max(jnp.abs(out - ref)))
    assert jnp.allclose(out, ref, atol=2e-2, rtol=2e-2), err
    print("KERNEL_OK")
</pallas_src>

<mosaic_0001>
module attributes {stable_mosaic.version = 11 : i64} {
  func.func @_gat_row_tile_kernel(%arg0: i32, %arg1: memref<16x32xf32, #tpu.memory_space<vmem>>, %arg2: memref<16x32xf32, #tpu.memory_space<vmem>>, %arg3: memref<16x16xbf16, #tpu.memory_space<vmem>>, %arg4: memref<32x256xf32, #tpu.memory_space<vmem>>, %arg5: memref<1x128xf32, #tpu.memory_space<vmem>>, %arg6: memref<16x128xf32, #tpu.memory_space<vmem>>) attributes {dimension_semantics = [#tpu.dimension_semantics<parallel>], iteration_bounds = array<i64: 1>, scalar_prefetch = 0 : i64, scratch_operands = 0 : i64, tpu.core_type = #tpu.core_type<tc>, window_params = [{transform_indices = @transform_0, window_bounds = array<i64: 16, 32>}, {pipeline_mode = #tpu.pipeline_mode<synchronous>, transform_indices = @transform_1, window_bounds = array<i64: 16, 32>}, {transform_indices = @transform_2, window_bounds = array<i64: 16, 16>}, {pipeline_mode = #tpu.pipeline_mode<synchronous>, transform_indices = @transform_3, window_bounds = array<i64: 32, 256>}, {pipeline_mode = #tpu.pipeline_mode<synchronous>, transform_indices = @transform_4, window_bounds = array<i64: 1, 128>}, {transform_indices = @transform_5, window_bounds = array<i64: 16, 128>}]} {
    %c0 = arith.constant 0 : index
    %c0_0 = arith.constant 0 : index
    %0 = vector.load %arg1[%c0, %c0_0] : memref<16x32xf32, #tpu.memory_space<vmem>>, vector<16x32xf32>
    %c0_1 = arith.constant 0 : index
    %c0_2 = arith.constant 0 : index
    %1 = vector.load %arg2[%c0_1, %c0_2] : memref<16x32xf32, #tpu.memory_space<vmem>>, vector<16x32xf32>
    %c0_3 = arith.constant 0 : index
    %c0_4 = arith.constant 0 : index
    %2 = vector.load %arg4[%c0_3, %c0_4] : memref<32x256xf32, #tpu.memory_space<vmem>>, vector<32x256xf32>
    %cst = arith.constant dense<0.000000e+00> : vector<16x256xf32>
    %3 = tpu.matmul %0, %2, %cst {dimension_numbers = #tpu.dot_dimension_numbers<[1], [0], [0], [1], [0, 0, 1, 1], [], []>} : vector<16x32xf32>, vector<32x256xf32>, vector<16x256xf32> -> vector<16x256xf32>
    %4 = vector.extract_strided_slice %3 {offsets = [0, 0], sizes = [16, 128], strides = [1, 1]} : vector<16x256xf32> to vector<16x128xf32>
    %5 = vector.extract_strided_slice %3 {offsets = [0, 128], sizes = [16, 128], strides = [1, 1]} : vector<16x256xf32> to vector<16x128xf32>
    %c0_5 = arith.constant 0 : index
    %c0_6 = arith.constant 0 : index
    %6 = vector.load %arg5[%c0_5, %c0_6] : memref<1x128xf32, #tpu.memory_space<vmem>>, vector<1x128xf32>
    %7 = vector.broadcast %6 : vector<1x128xf32> to vector<16x128xf32>
    %8 = arith.addf %5, %7 : vector<16x128xf32>
    %9 = vector.extract_strided_slice %2 {offsets = [0, 0], sizes = [32, 128], strides = [1, 1]} : vector<32x256xf32> to vector<32x128xf32>
    %cst_7 = arith.constant dense<0.000000e+00> : vector<16x128xf32>
    %10 = tpu.matmul %1, %9, %cst_7 {dimension_numbers = #tpu.dot_dimension_numbers<[1], [0], [0], [1], [0, 0, 1, 1], [], []>} : vector<16x32xf32>, vector<32x128xf32>, vector<16x128xf32> -> vector<16x128xf32>
    %11 = arith.truncf %4 : vector<16x128xf32> to vector<16x128xbf16>
    %12 = arith.truncf %10 : vector<16x128xf32> to vector<16x128xbf16>
    %cst_8 = arith.constant dense<0.000000e+00> : vector<16x16xf32>
    %13 = tpu.matmul %11, %12, %cst_8 {dimension_numbers = #tpu.dot_dimension_numbers<[1], [1], [0], [0], [0, 0, 1, 0], [], []>} : vector<16x128xbf16>, vector<16x128xbf16>, vector<16x16xf32> -> vector<16x16xf32>
    %cst_9 = arith.constant 0.000000e+00 : f32
    %14 = vector.broadcast %cst_9 : f32 to vector<16x16xf32>
    %15 = arith.cmpf oge, %13, %14 : vector<16x16xf32>
    %cst_10 = arith.constant 2.000000e-01 : f32
    %16 = vector.broadcast %cst_10 : f32 to vector<16x16xf32>
    %17 = arith.mulf %16, %13 : vector<16x16xf32>
    %18 = arith.select %15, %13, %17 : vector<16x16xi1>, vector<16x16xf32>
    %c0_11 = arith.constant 0 : index
    %c0_12 = arith.constant 0 : index
    %19 = vector.load %arg3[%c0_11, %c0_12] : memref<16x16xbf16, #tpu.memory_space<vmem>>, vector<16x16xbf16>
    %20 = arith.extf %19 : vector<16x16xbf16> to vector<16x16xf32>
    %cst_13 = arith.constant 0.000000e+00 : f32
    %21 = vector.broadcast %cst_13 : f32 to vector<16x16xf32>
    %22 = arith.cmpf ogt, %20, %21 : vector<16x16xf32>
    %cst_14 = arith.constant -1.000000e+30 : f32
    %23 = vector.broadcast %cst_14 : f32 to vector<16x16xf32>
    %24 = arith.select %22, %18, %23 : vector<16x16xi1>, vector<16x16xf32>
    %cst_15 = arith.constant dense<0xFF800000> : vector<16xf32>
    %25 = vector.multi_reduction <maximumf>, %24, %cst_15 [1] : vector<16x16xf32> to vector<16xf32>
    %26 = vector.shape_cast %25 : vector<16xf32> to vector<16x1xf32>
    %27 = vector.broadcast %26 : vector<16x1xf32> to vector<16x16xf32>
    %28 = arith.subf %24, %27 : vector<16x16xf32>
    %29 = math.exp %28 : vector<16x16xf32>
    %30 = arith.mulf %29, %20 : vector<16x16xf32>
    %cst_16 = arith.constant dense<0.000000e+00> : vector<16xf32>
    %31 = vector.multi_reduction <add>, %30, %cst_16 [1] : vector<16x16xf32> to vector<16xf32>
    %32 = vector.shape_cast %31 : vector<16xf32> to vector<16x1xf32>
    %cst_17 = arith.constant dense<0.000000e+00> : vector<16xf32>
    %33 = vector.multi_reduction <add>, %20, %cst_17 [1] : vector<16x16xf32> to vector<16xf32>
    %34 = vector.shape_cast %33 : vector<16xf32> to vector<16x1xf32>
    %cst_18 = arith.constant 1.000000e+00 : f32
    %35 = vector.broadcast %cst_18 : f32 to vector<16x1xf32>
    %36 = arith.maximumf %34, %35 : vector<16x1xf32>
    %37 = arith.mulf %32, %36 : vector<16x1xf32>
    %cst_19 = arith.constant 1.000000e-30 : f32
    %38 = vector.broadcast %cst_19 : f32 to vector<16x1xf32>
    %39 = arith.maximumf %37, %38 : vector<16x1xf32>
    %40 = tpu.reciprocal %39 {approx = true} : vector<16x1xf32> -> vector<16x1xf32>
    %41 = vector.broadcast %40 : vector<16x1xf32> to vector<16x16xf32>
    %42 = arith.mulf %30, %41 : vector<16x16xf32>
    %43 = arith.truncf %42 : vector<16x16xf32> to vector<16x16xbf16>
    %cst_20 = arith.constant dense<0.000000e+00> : vector<16x128xf32>
    %44 = tpu.matmul %43, %12, %cst_20 {dimension_numbers = #tpu.dot_dimension_numbers<[1], [0], [0], [1], [0, 0, 1, 1], [], []>} : vector<16x16xbf16>, vector<16x128xbf16>, vector<16x128xf32> -> vector<16x128xf32>
    %45 = arith.addf %44, %8 : vector<16x128xf32>
    %cst_21 = arith.constant 0.000000e+00 : f32
    %46 = vector.broadcast %cst_21 : f32 to vector<16x128xf32>
    %47 = arith.cmpf ogt, %45, %46 : vector<16x128xf32>
    %48 = math.exp %45 : vector<16x128xf32>
    %cst_22 = arith.constant 1.000000e+00 : f32
    %49 = vector.broadcast %cst_22 : f32 to vector<16x128xf32>
    %50 = arith.subf %48, %49 : vector<16x128xf32>
    %51 = arith.select %47, %45, %50 : vector<16x128xi1>, vector<16x128xf32>
    %c0_23 = arith.constant 0 : index
    %c0_24 = arith.constant 0 : index
    %52 = vector.load %arg6[%c0_23, %c0_24] : memref<16x128xf32, #tpu.memory_space<vmem>>, vector<16x128xf32>
    tpu.vector_store %arg6[%c0_23, %c0_24], %51 {strides = array<i32>} : memref<16x128xf32, #tpu.memory_space<vmem>>, vector<16x128xf32>,
    return
  }
  func.func @transform_0(%arg0: i32) -> (i32, i32) {
    %c0_i32 = arith.constant 0 : i32
    %c0_i32_0 = arith.constant 0 : i32
    return %arg0, %c0_i32 : i32, i32
  }
  func.func @transform_1(%arg0: i32) -> (i32, i32) {
    %c0_i32 = arith.constant 0 : i32
    %c0_i32_0 = arith.constant 0 : i32
    %c0_i32_1 = arith.constant 0 : i32
    return %c0_i32, %c0_i32_0 : i32, i32
  }
  func.func @transform_2(%arg0: i32) -> (i32, i32) {
    %c0_i32 = arith.constant 0 : i32
    %c0_i32_0 = arith.constant 0 : i32
    return %arg0, %c0_i32 : i32, i32
  }
  func.func @transform_3(%arg0: i32) -> (i32, i32) {
    %c0_i32 = arith.constant 0 : i32
    %c0_i32_0 = arith.constant 0 : i32
    %c0_i32_1 = arith.constant 0 : i32
    return %c0_i32, %c0_i32_0 : i32, i32
  }
  func.func @transform_4(%arg0: i32) -> (i32, i32) {
    %c0_i32 = arith.constant 0 : i32
    %c0_i32_0 = arith.constant 0 : i32
    %c0_i32_1 = arith.constant 0 : i32
    return %c0_i32, %c0_i32_0 : i32, i32
  }
  func.func @transform_5(%arg0: i32) -> (i32, i32) {
    %c0_i32 = arith.constant 0 : i32
    %c0_i32_0 = arith.constant 0 : i32
    return %arg0, %c0_i32 : i32, i32
  }
}

</mosaic_0001>

<bundles_post_ra>
// kernel: tpu_custom_call.1
= control target key start
LH: loop header
LB: loop body
LE: loop exit
PB: predicated region body
PF: predicated region fallthrough
CT: control target
= control target key end

     0   :  { %10 = vsyncpa [#allocation3], 0  ;;  %s698_s0 = inlined_call_operand.hbm [shape: f32[16,32], index: 0, kind: input, shape index: {}]   ;;  %s699_s1 = inlined_call_operand.hbm [shape: f32[16,32], index: 1, kind: input, shape index: {}]   ;;  %s700_s2 = inlined_call_operand.hbm [shape: bf16[16,16], index: 2, kind: input, shape index: {}]   ;;  %s701_s3 = inlined_call_operand.hbm [shape: f32[32,256], index: 3, kind: input, shape index: {}]   ;;  %s702_s4 = inlined_call_operand.vmem [shape: f32[1,128], index: 4, kind: input, shape index: {}]   ;;  %s703_s5 = inlined_call_operand.hbm [shape: f32[16,128], index: 5, kind: output, shape index: {}]  }
   0x1   :  { %11 = vsyncpa [#allocation6], 0 }
   0x2   :  { %12 = vsyncpa [#allocation9], 0 }
   0x3   :  { %13 = vsyncpa [#allocation4], 0  ;;  %s611_s18 = smov [#allocation5]   ;;  %s612_s20 = smov [#allocation2]  }
   0x4   :  { %s31_s19 = sshll.u32 %s611_s18, 4  ;;  %s19_s21 = sshll.u32 %s612_s20, 4  ;;  %s32_s19 = int_to_ptr.vmem [resolvable:$true] %s31_s19  ;;  %s20_s21 = int_to_ptr.vmem [resolvable:$true] %s19_s21 }
   0x5   :  { %s511_s22 = scalar_lea.vmem %s32_s19, 256  ;;  %p516_p1 = scmp.lt.s32.totalorder %s32_s19, %s32_s19 }
   0x6   :  { %p512_p0 = scmp.ne.s32.totalorder %s32_s19, %s511_s22  ;;  %p517_p2 = scmp.lt.s32.totalorder %s511_s22, %s511_s22 }
   0x8   :  { %p518_p3 = por %p517_p2, %p516_p1 }
   0xa   :  { %p519_p4 = pnand %p518_p3, %p512_p0 }
   0xc   :  { %522 = shalt.err (!%p519_p4)
}
   0xd   :  { %s613_s23 = smov 128   ;;  %s614_s24 = smov 8  }
   0xe   :  { %37 = dma.hbm_to_vmem [thread:$0]  %s699_s1, 256, %s32_s19, [#allocation6], %s613_s23, %s613_s23, %s614_s24  }
   0xf   :  { %s531_s27 = scalar_lea.vmem %s20_s21, 256  ;;  %p536_p6 = scmp.lt.s32.totalorder %s20_s21, %s20_s21 }
  0x10   :  { %p532_p5 = scmp.ne.s32.totalorder %s20_s21, %s531_s27  ;;  %p537_p7 = scmp.lt.s32.totalorder %s531_s27, %s531_s27 }
  0x12   :  { %p538_p8 = por %p537_p7, %p536_p6 }
  0x14   :  { %p539_p9 = pnand %p538_p8, %p532_p5 }
  0x16   :  { %542 = shalt.err (!%p539_p9)
}
  0x17   :  { %25 = dma.hbm_to_vmem [thread:$0]  %s698_s0, 256, %s20_s21, [#allocation3], %s613_s23, %s613_s23, %s614_s24  }
  0x18   :  { %s615_s30 = smov [#allocation7]  }
  0x19   :  { %s43_s6 = sshll.u32 %s615_s30, 4  ;;  %s44_s6 = int_to_ptr.vmem [resolvable:$true] %s43_s6 }
  0x1a   :  { %s551_s7 = scalar_lea.vmem %s44_s6, 128  ;;  %p556_p11 = scmp.lt.s32.totalorder %s44_s6, %s44_s6 }
  0x1b   :  { %p552_p10 = scmp.ne.s32.totalorder %s44_s6, %s551_s7  ;;  %p557_p12 = scmp.lt.s32.totalorder %s551_s7, %s551_s7 }
  0x1d   :  { %p558_p13 = por %p557_p12, %p556_p11 }
  0x1f   :  { %p559_p0 = pnand %p558_p13, %p552_p10 }
  0x21   :  { %562 = shalt.err (!%p559_p0)
}
  0x22   :  { %s616_s1 = smov 64   ;;  %s617_s8 = smov 4  }
  0x23   :  { %49 = dma.hbm_to_vmem [thread:$0]  %s700_s2, 128, %s44_s6, [#allocation6], %s616_s1, %s616_s1, %s617_s8  }
  0x24   :  { %s618_s11 = smov [#allocation8]  }
  0x25   :  { %s55_s12 = sshll.u32 %s618_s11, 4  ;;  %s56_s12 = int_to_ptr.vmem [resolvable:$true] %s55_s12 }
  0x26   :  { %s571_s0 = scalar_lea.vmem %s56_s12, 1024  ;;  %p576_p2 = scmp.lt.s32.totalorder %s56_s12, %s56_s12 }
  0x27   :  { %p572_p1 = scmp.ne.s32.totalorder %s56_s12, %s571_s0  ;;  %p577_p3 = scmp.lt.s32.totalorder %s571_s0, %s571_s0 }
  0x29   :  { %p578_p4 = por %p577_p3, %p576_p2 }
  0x2b   :  { %p579_p5 = pnand %p578_p4, %p572_p1 }
  0x2d   :  { %582 = shalt.err (!%p579_p5)
}
  0x2e   :  { %s619_s13 = smov 256   ;;  %s620_s14 = smov 16  }
  0x2f   :  { %61 = dma.hbm_to_vmem [thread:$0]  %s701_s3, 1024, %s56_s12, [#allocation9], %s619_s13, %s619_s13, %s620_s14  }
  0x30   :  { %603 = dma.done.wait [#allocation3], 256  }
  0x31   :  { %604 = vsyncadd [#allocation3], 4294967040 }
  0x32   :  { %605 = dma.done.wait [#allocation6], 384  }
  0x33   :  { %606 = vsyncadd [#allocation6], 4294966912 }
  0x34   :  { %607 = dma.done.wait [#allocation9], 1024  }
  0x35   :  { %608 = vsyncadd [#allocation9], 4294966272  ;;  %v621_v0 = vmov 0.0   ;;  %v87_v1 = vld [vmem:[#allocation8 + $0x30] sm:$0xff]  ;;  %v88_v2 = vld [vmem:[#allocation8 + $0x38] sm:$0xff]  ;;  %vm89_vm0 = vcmask 261120  }
  0x36   :  { %160 = vmatprep.mubr.f32.mxu0 %v621_v0  ;;  %v85_v3 = vld [vmem:[#allocation8 + $0x20] sm:$0xff]  ;;  %455 = vmatprep.subr.mxu1 %v87_v1  ;;  %v86_v4 = vld [vmem:[#allocation8 + $0x28] sm:$0xff]  ;;  %v83_v5 = vld [vmem:[#allocation8 + $0x10] sm:$0xff]  ;;  %vm622_vm1 = vmmov 0   ;;  %vm320_vm4 = vcmask 130048   ;;  %s623_s17 = smov [#allocation10]  }
  0x37   :  { %120 = vmatprep.subr.mxu0 %v88_v2  ;;  %456 = vmatpush3.msra.mxu1 %v87_v1  ;;  %v84_v6 = vld [vmem:[#allocation8 + $0x18] sm:$0xff]  ;;  %v81_v7 = vld [vmem:[#allocation8] sm:$0xff]  ;;  %v79_v8 = vld [vmem:[#allocation5] sm:$0xff] }
  0x38   :  { %121 = vmatpush1.msra.mxu0 %v87_v1  ;;  %457 = vmatprep.subr.mxu1 %v85_v3  ;;  %v82_v9 = vld [vmem:[#allocation8 + $0x8] sm:$0xff]  ;;  %v80_v10 = vld [vmem:[#allocation5 + $0x8] sm:$0xff]  ;;  %v77_v11 = vld [vmem:[#allocation2] sm:$0xff] }
  0x39   :  { %122 = vmatprep.subr.mxu0 %v86_v4  ;;  %458 = vmatpush3.msra.mxu1 %v85_v3  ;;  %v78_v12 = vld [vmem:[#allocation2 + $0x8] sm:$0xff]  ;;  %v442_v20 = vld [vmem:[#allocation7] sm:$0xff]  }
  0x3a   :  { %123 = vmatpush1.msra.mxu0 %v85_v3  ;;  %459 = vmatprep.subr.mxu1 %v83_v5  ;;  %v443_v21 = vunpack.c.l.bf16 %v442_v20  ;;  %v444_v25 = vunpack.c.h.bf16 %v442_v20  ;;  %v435_v1 = vld [vmem:[%s702_s4] ss:$0 sm:$0xff]  ;;  %s419_s4 = sshll.u32 %s623_s17, 4  ;;  %s420_s4 = int_to_ptr.vmem [resolvable:$true] %s419_s4 }
  0x3b   :  { %124 = vmatprep.subr.mxu0 %v84_v6  ;;  %460 = vmatpush3.msra.mxu1 %v83_v5  ;;  %s583_s18 = scalar_lea.vmem %s420_s4, 256  ;;  %p588_p7 = scmp.lt.s32.totalorder %s420_s4, %s420_s4 }
  0x3c   :  { %125 = vmatpush1.msra.mxu0 %v83_v5  ;;  %461 = vmatprep.subr.mxu1 %v81_v7  ;;  %vm316_vm3 = vcmp.gt.f32.partialorder %v443_v21, 0.0  ;;  %vm317_vm6 = vcmp.gt.f32.partialorder %v444_v25, 0.0  ;;  %v341_v36 = vsel %vm320_vm4, %v443_v21, 0.0  ;;  %v344_v37 = vsel %vm320_vm4, %v444_v25, 0.0  ;;  %p584_p6 = scmp.ne.s32.totalorder %s420_s4, %s583_s18  ;;  %p589_p8 = scmp.lt.s32.totalorder %s583_s18, %s583_s18 }
  0x3d   :  { %463 = vmatprep.mubr.msk.f32.mxu1 %vm89_vm0, %v79_v8  ;;  %462 = vmatpush3.msra.mxu1 %v81_v7 }
  0x3e   :  { %126 = vmatprep.subr.mxu0 %v82_v9  ;;  %464 = vmatmul.mubr.msk.f32.vlgmr.msra.gmra.mxu1 %vm89_vm0, %v80_v10  ;;  %p590_p9 = por %p589_p8, %p588_p7 }
  0x3f   :  { %127 = vmatpush1.msra.mxu0 %v81_v7  ;;  %472 = vmatprep.subr.bf16.mxu1 %v621_v0 }
  0x40   :  { %433 = vmatmul.mubr.msk.f32.vlgmr.msra.gmra.mxu0 %vm89_vm0, %v77_v11  ;;  %466 = vmatprep.subr.bf16.mxu0 %v621_v0  ;;  %p591_p10 = pnand %p590_p9, %p584_p6 }
  0x41   :  { %166 = vmatprep.mubr.f32.mxu0 %v621_v0  ;;  %474 = vmatprep.mubr.msk.bf16.mxu1 %vm622_vm1, %v621_v0 }
  0x42   :  { %342 = vadd.xlane.f32.xlu1 %v341_v36 }
  0x44   :  { %434 = vmatmul.mubr.msk.f32.gmra.mxu0 %vm89_vm0, %v78_v12 }
  0x45   :  { %468 = vmatprep.mubr.msk.bf16.mxu0 %vm622_vm1, %v621_v0 }
  0x46   :  { %345 = vadd.xlane.f32.xlu1 %v344_v37 }
  0xcb   :  { %v343_v50 = vpop.xlane.xlu1 %342 }
  0xcc   :  { %v347_v52 = vmax.f32 %v343_v50, 1.0 }
  0xcf   :  { %v346_v51 = vpop.xlane.xlu1 %345 }
  0xd0   :  { %v348_v55 = vmax.f32 %v346_v51, 1.0 }
  0xfe   :  { %v465_v13 = vpop.f32.mrf.mxu1 }
 0x100   :  { %v162_v14 = vpop.f32.mrf.mxu0  ;;  %v254_v15 = vpop.f32.mrf.mxu1 }
 0x101   :  { %v264_v16 = vpack.c.bf16 %v465_v13, %v254_v15 }
 0x102   :  { %v676_v17 = vpop.f32.mrf.mxu0 }
 0x103   :  { %467 = vmatpush3.bf16.xpose.msra.mxu0 %v264_v16  ;;  %473 = vmatpush3.bf16.msra.mxu1 %v264_v16  ;;  %v180_v2 = vadd.f32 %v435_v1, %v676_v17 }
 0x104   :  { %v168_v18 = vpop.f32.mrf.mxu0 }
 0x105   :  { %v263_v19 = vpack.c.bf16 %v168_v18, %v162_v14 }
 0x106   :  { %v678_v22 = vpop.f32.mrf.mxu0 }
 0x107   :  { %v181_v6 = vadd.f32 %v435_v1, %v678_v22 }
 0x10a   :  { %469 = vmatmul.mubr.bf16.vlgmr.msra.gmra.mxu0 %v263_v19 }
 0x1ca   :  { %v299_v23 = vpop.f32.mrf.mxu0 }
 0x1cb   :  { %vm306_vm2 = vcmp.ge.f32.partialorder %v299_v23, 0.0  ;;  %v308_v24 = vmul.f32 0.2, %v299_v23 }
 0x1cc   :  { %v470_v26 = vpop.f32.mrf.mxu0 }
 0x1cd   :  { %v310_v27 = vsel %vm306_vm2, %v299_v23, %v308_v24 }
 0x1ce   :  { %v302_v28 = vpop.f32.mrf.mxu0  ;;  %v318_v29 = vsel %vm316_vm3, %v310_v27, -1e+30 }
 0x1cf   :  { %vm307_vm5 = vcmp.ge.f32.partialorder %v302_v28, 0.0  ;;  %v309_v30 = vmul.f32 0.2, %v302_v28  ;;  %v321_v31 = vsel %vm320_vm4, %v318_v29, -inf }
 0x1d0   :  { %322 = vmax.xlane.f32.xlu0 %v321_v31  ;;  %v471_v32 = vpop.f32.mrf.mxu0 }
 0x1d1   :  { %v311_v33 = vsel %vm307_vm5, %v302_v28, %v309_v30 }
 0x1d2   :  { %v319_v34 = vsel %vm317_vm6, %v311_v33, -1e+30 }
 0x1d3   :  { %v324_v35 = vsel %vm320_vm4, %v319_v34, -inf }
 0x1d4   :  { %325 = vmax.xlane.f32.xlu0 %v324_v35 }
 0x259   :  { %v323_v38 = vpop.xlane.xlu0 %322 }
 0x25a   :  { %v327_v39 = vsub.f32 %v318_v29, %v323_v38 }
 0x25c   :  { %v329_v40 = vmul.f32 1.442695, %v327_v39 }
 0x25d   :  { %v326_v41 = vpop.xlane.xlu0 %325 }
 0x25e   :  { %491 = vpow2.f32 %v329_v40  ;;  %v328_v42 = vsub.f32 %v319_v34, %v326_v41 }
 0x260   :  { %v331_v43 = vmul.f32 1.442695, %v328_v42 }
 0x262   :  { %493 = vpow2.f32 %v331_v43 }
 0x26b   :  { %v492_v44 = vpop.eup %491 }
 0x26c   :  { %v333_v45 = vmul.f32 %v492_v44, %v443_v21 }
 0x26e   :  { %v335_v46 = vsel %vm320_vm4, %v333_v45, 0.0 }
 0x26f   :  { %v494_v47 = vpop.eup %493  ;;  %336 = vadd.xlane.f32.xlu0 %v335_v46 }
 0x270   :  { %v334_v48 = vmul.f32 %v494_v47, %v444_v25 }
 0x272   :  { %v338_v49 = vsel %vm320_vm4, %v334_v48, 0.0 }
 0x273   :  { %339 = vadd.xlane.f32.xlu1 %v338_v49 }
 0x2f8   :  { %v337_v53 = vpop.xlane.xlu0 %336 }
 0x2f9   :  { %v349_v54 = vmul.f32 %v347_v52, %v337_v53 }
 0x2fb   :  { %v351_v56 = vmax.f32 %v349_v54, 1e-30 }
 0x2fc   :  { %v340_v57 = vpop.xlane.xlu1 %339 }
 0x2fd   :  { %v350_v58 = vmul.f32 %v348_v55, %v340_v57  ;;  %495 = vrcp.f32 %v351_v56 }
 0x2ff   :  { %v352_v59 = vmax.f32 %v350_v58, 1e-30 }
 0x301   :  { %497 = vrcp.f32 %v352_v59 }
 0x30a   :  { %v496_v60 = vpop.eup %495 }
 0x30b   :  { %v355_v62 = vmul.f32 %v496_v60, %v333_v45 }
 0x30e   :  { %v498_v61 = vpop.eup %497 }
 0x30f   :  { %v356_v63 = vmul.f32 %v498_v61, %v334_v48 }
 0x311   :  { %v357_v0 = vpack.c.bf16 %v356_v63, %v355_v62 }
 0x313   :  { %475 = vmatmul.mubr.msk.bf16.vlgmr.msra.gmra.mxu1 %vm320_vm4, %v357_v0 }
 0x3d3   :  { %v395_v3 = vpop.f32.mrf.mxu1 }
 0x3d4   :  { %v396_v4 = vadd.f32 %v395_v3, %v180_v2 }
 0x3d5   :  { %v476_v5 = vpop.f32.mrf.mxu1 }
 0x3d6   :  { %v404_v7 = vmul.f32 1.442695, %v396_v4  ;;  %vm402_vm7 = vcmp.gt.f32.partialorder %v396_v4, 0.0 }
 0x3d7   :  { %v398_v8 = vpop.f32.mrf.mxu1 }
 0x3d8   :  { %499 = vpow2.f32 %v404_v7  ;;  %v399_v9 = vadd.f32 %v398_v8, %v181_v6 }
 0x3d9   :  { %v477_v10 = vpop.f32.mrf.mxu1 }
 0x3da   :  { %v406_v11 = vmul.f32 1.442695, %v399_v9  ;;  %vm403_vm8 = vcmp.gt.f32.partialorder %v399_v9, 0.0 }
 0x3dc   :  { %501 = vpow2.f32 %v406_v11 }
 0x3e5   :  { %v500_v12 = vpop.eup %499 }
 0x3e6   :  { %v439_v13 = vadd.f32 -1.0, %v500_v12 }
 0x3e8   :  { %v410_v14 = vsel %vm402_vm7, %v396_v4, %v439_v13 }
 0x3e9   :  { %v502_v15 = vpop.eup %501  ;;  %412 = vst [vmem:[#allocation10] sm:$0xff] %v410_v14 }
 0x3ea   :  { %v440_v16 = vadd.f32 -1.0, %v502_v15 }
 0x3ec   :  { %v411_v17 = vsel %vm403_vm8, %v399_v9, %v440_v16 }
 0x3ed   :  { %413 = vst [vmem:[#allocation10 + $0x8] sm:$0xff] %v411_v17 }
 0x3ee   :  { %594 = shalt.err (!%p591_p10)
}
 0x3ef   :  { %425 = dma.vmem_to_hbm [thread:$0]  %s420_s4, 256, %s703_s5, [#allocation4], %s613_s23, %s613_s23, %s614_s24  }
 0x3f0   :  { %609 = dma.done.wait [#allocation4], 256  }
 0x3f1   :  { %610 = vsyncadd [#allocation4], 4294967040 }
 0x3f2   :  { %429 = vsyncpa [#allocation3], 1 }
 0x3f3   :  { %430 = vsyncpa [#allocation6], 1 }
 0x3f4   :  { %431 = vsyncpa [#allocation9], 1 }
 0x3f5   :  { %432 = vsyncpa [#allocation4], 1 }

</bundles_post_ra>
